<compile_context>
chip_gen: v7x
topology: tpu7x:2x2x1
jax: 0.10.0
libtpu: 0.0.40
codegen_flags: <defaults>
</compile_context>

<pallas_src>
import jax
import jax.numpy as jnp
from jax.experimental import pallas as pl
from jax.experimental.pallas import tpu as pltpu


# --------------------------------------------------------------------------- #
# Kernel 1: RBF coefficients  c = TPS(x, centers) @ kcoef + poly(x)            #
#   grid = (B-tiles, M-chunks); c-tile accumulates across the M axis.          #
# --------------------------------------------------------------------------- #
def rbf_coeff_kernel(xe_ref, yeT_ref, y2_ref, kcoef_ref, pw_ref, bias_ref, c_ref):
    # Initialize the resident c-tile with the (eps-folded) degree-1 polynomial
    # tail on the first M-chunk; later chunks only accumulate the kernel part.
    @pl.when(pl.program_id(1) == 0)
    def _():
        c_ref[...] = (
            jnp.dot(xe_ref[...], pw_ref[...], preferred_element_type=jnp.float32)
            + bias_ref[...]
        )

    xe = xe_ref[...]                                          # [tb, P] eps*x
    # Pairwise squared distances to this chunk of pre-scaled centers:
    #   d2 = ||xe||^2 + ||eps*y||^2 - 2 * xe @ (eps*y)^T   (cross term on MXU)
    x2 = jnp.sum(xe * xe, axis=1, keepdims=True)              # [tb, 1]
    cross = jnp.dot(xe, yeT_ref[...], preferred_element_type=jnp.float32)  # [tb, tm]
    d2 = jnp.maximum(x2 + y2_ref[...] - 2.0 * cross, 0.0)
    # Thin-plate spline without sqrt: r^2*log(r) = 0.5*d2*log(d2), 0 at d2 == 0.
    safe_d2 = jnp.where(d2 > 0.0, d2, 1.0)
    K = jnp.where(d2 > 0.0, 0.5 * d2 * jnp.log(safe_d2), 0.0)  # [tb, tm]
    c_ref[...] += jnp.dot(K, kcoef_ref[...], preferred_element_type=jnp.float32)


# --------------------------------------------------------------------------- #
# Kernel 2: POD expansion  out = c @ basis                                     #
#   grid = (N-tiles, B-tiles); basis tile is reused across the inner B axis.   #
# --------------------------------------------------------------------------- #
def pod_expand_kernel(c_ref, basis_ref, o_ref):
    o_ref[...] = jnp.dot(
        c_ref[...], basis_ref[...], preferred_element_type=jnp.float32
    ).astype(o_ref.dtype)


def _vmem_limit(need_bytes):
    # Leave headroom above the computed tile footprint; never exceed v7x's
    # 64 MiB physical VMEM (v5e/v6e have 128 MiB, so 64 MiB is always safe).
    return int(min(max(need_bytes + (2 << 20), 16 << 20), 64 << 20))


def pod_rbf_forward(x, y, eps, shift, scale, kcoef, pcoef, basis, *,
                    tb=None, tn=None, tm=None,
                    basis_dtype=jnp.bfloat16, out_dtype=jnp.float32):
    x = x.astype(jnp.float32)
    B, P = x.shape
    M = y.shape[0]
    R, N = basis.shape

    # ---- Fit-time constants hoisted out of the kernels (in a deployment these
    #      would be cached at fit() time; recomputed per call to stay
    #      self-contained). ----------------------------------------------------
    eps_f = jnp.float32(eps)
    xe = x * eps_f                                              # eps folded into x
    yeT = (y.astype(jnp.float32) * eps_f).T                     # [P, M] pre-transposed
    y2 = jnp.sum(yeT * yeT, axis=0)[None, :]                    # [1, M]
    inv_scale = 1.0 / scale.astype(jnp.float32)
    pcoef = pcoef.astype(jnp.float32)
    pw = pcoef[1:] * (inv_scale / eps_f)[:, None]               # poly weights on eps*x
    bias = pcoef[0:1] - (shift.astype(jnp.float32) * inv_scale)[None, :] @ pcoef[1:]
    kcoef = kcoef.astype(jnp.float32)
    basis_c = basis.astype(basis_dtype)                         # bf16 storage, f32 accum

    # ---- Tile sizes ----------------------------------------------------------
    if tb is None:
        tb = B if B <= 128 else 128
    tb = min(tb, B)
    if tm is None:
        tm = M if M <= 2048 else 2048
    tm = min(tm, M)
    if tn is None:
        tn = N if N <= 8192 else 8192                           # large, lane-dense N tile
    tn = min(tn, N)

    # Pad the center axis so every M-chunk is full; padded centers sit at the
    # origin with zero kernel coefficients, so they contribute exactly zero.
    nm = pl.cdiv(M, tm)
    Mp = nm * tm
    if Mp != M:
        pad = Mp - M
        yeT = jnp.pad(yeT, ((0, 0), (0, pad)))
        y2 = jnp.pad(y2, ((0, 0), (0, pad)))
        kcoef = jnp.pad(kcoef, ((0, pad), (0, 0)))

    nb = pl.cdiv(B, tb)
    nn = pl.cdiv(N, tn)
    basis_bytes = jnp.dtype(basis_dtype).itemsize
    out_bytes = jnp.dtype(out_dtype).itemsize

    # ---- Kernel 1: RBF coefficients  c [B, R] --------------------------------
    coeff_block_bytes = 4 * (tb * P + P * tm + tm + tm * R + P * R + R + tb * R)
    coeff_temp_bytes = 4 * 4 * tb * tm                          # cross/d2/safe/K tiles
    coeff_cost = pl.CostEstimate(
        flops=int(2 * B * (Mp * P + Mp * R + P * R) + 6 * B * Mp),
        transcendentals=int(B * Mp),
        bytes_accessed=int(4 * (B * P + nb * (P * Mp + Mp + Mp * R) + P * R + R + B * R)),
    )
    c = pl.pallas_call(
        rbf_coeff_kernel,
        out_shape=jax.ShapeDtypeStruct((B, R), jnp.float32),
        grid=(nb, nm),
        in_specs=[
            pl.BlockSpec((tb, P), lambda i, k: (i, 0)),         # eps*x
            pl.BlockSpec((P, tm), lambda i, k: (0, k)),         # (eps*y)^T chunk
            pl.BlockSpec((1, tm), lambda i, k: (0, k)),         # ||eps*y||^2 chunk
            pl.BlockSpec((tm, R), lambda i, k: (k, 0)),         # kernel coeff chunk
            pl.BlockSpec((P, R), lambda i, k: (0, 0)),          # poly weights (tiny)
            pl.BlockSpec((1, R), lambda i, k: (0, 0)),          # poly bias row (tiny)
        ],
        out_specs=pl.BlockSpec((tb, R), lambda i, k: (i, 0)),   # resident across M axis
        compiler_params=pltpu.CompilerParams(
            dimension_semantics=("parallel", "arbitrary"),      # M axis carries c
            vmem_limit_bytes=_vmem_limit(2 * coeff_block_bytes + coeff_temp_bytes),
        ),
        cost_estimate=coeff_cost,
    )(xe, yeT, y2, kcoef, pw, bias)

    # ---- Kernel 2: POD expansion  out [B, N] ----------------------------------
    expand_block_bytes = basis_bytes * R * tn + 4 * tb * R + out_bytes * tb * tn
    expand_cost = pl.CostEstimate(
        flops=int(2 * B * R * N),
        transcendentals=0,
        bytes_accessed=int(basis_bytes * R * N + 4 * nn * B * R + out_bytes * B * N),
    )
    out = pl.pallas_call(
        pod_expand_kernel,
        out_shape=jax.ShapeDtypeStruct((B, N), out_dtype),
        # N outermost: each basis tile is DMA'd once and reused for every
        # B-tile; c is tiny so re-fetching it per step is free.
        grid=(nn, nb),
        in_specs=[
            pl.BlockSpec((tb, R), lambda j, i: (i, 0)),         # RBF coefficients
            pl.BlockSpec((R, tn), lambda j, i: (0, j)),         # POD basis tile (bf16)
        ],
        out_specs=pl.BlockSpec((tb, tn), lambda j, i: (i, j)),
        compiler_params=pltpu.CompilerParams(
            # No carried state: both axes parallel -> both v7x TensorCores are
            # used even when B fits in a single tile.
            dimension_semantics=("parallel", "parallel"),
            vmem_limit_bytes=_vmem_limit(2 * expand_block_bytes),
        ),
        cost_estimate=expand_cost,
    )(c, basis_c)
    return out


def ref_forward(x, y, eps, shift, scale, kcoef, pcoef, basis):
    d2 = jnp.sum((x[:, None, :] * eps - y[None, :, :] * eps) ** 2, axis=-1)
    K = jnp.where(d2 > 0.0, 0.5 * d2 * jnp.log(jnp.where(d2 > 0.0, d2, 1.0)), 0.0)
    xhat = (x - shift) / scale
    Pm = jnp.concatenate([jnp.ones((x.shape[0], 1), jnp.float32), xhat], axis=1)
    c = K @ kcoef + Pm @ pcoef
    return c @ basis


if __name__ == "__main__":
    # Small synthetic shapes consistent with the module's forward:
    #   B query parameter points of dim P, M fitted RBF centers,
    #   POD rank R, full field size N.
    B, P, M, R, N = 8, 3, 16, 4, 256

    key = jax.random.PRNGKey(0)
    k1, k2, k3, k4, k5, k6, k7 = jax.random.split(key, 7)

    x = jax.random.normal(k1, (B, P), jnp.float32)                   # query parameters
    y = jax.random.normal(k2, (M, P), jnp.float32)                   # RBF centers (fit)
    shift = jax.random.normal(k3, (P,), jnp.float32)                 # poly shift (fit)
    scale = jnp.abs(jax.random.normal(k4, (P,), jnp.float32)) + 0.5  # poly scale (fit)
    kcoef = jax.random.normal(k5, (M, R), jnp.float32) * 0.1         # rbf coeffs (kernel)
    pcoef = jax.random.normal(k6, (1 + P, R), jnp.float32) * 0.1     # rbf coeffs (poly)
    basis = jax.random.normal(k7, (R, N), jnp.float32)               # POD basis (fit)
    eps = 1.0                                                        # scipy TPS default

    out = pod_rbf_forward(x, y, eps, shift, scale, kcoef, pcoef, basis)
    out = jax.block_until_ready(out)
    assert out.shape == (B, N)

    # Reference uses the same bf16-quantized basis so the comparison isolates
    # kernel arithmetic from the (intentional) storage quantization.
    basis_q = basis.astype(jnp.bfloat16).astype(jnp.float32)
    ref = ref_forward(x, y, eps, shift, scale, kcoef, pcoef, basis_q)
    assert jnp.allclose(out, ref, atol=1e-3, rtol=1e-3), "mismatch vs JAX reference"
    print("KERNEL_OK")
</pallas_src>

<mosaic_0001>
module attributes {stable_mosaic.version = 11 : i64} {
  func.func @rbf_coeff_kernel(%arg0: i32, %arg1: i32, %arg2: memref<8x3xf32, #tpu.memory_space<vmem>>, %arg3: memref<3x16xf32, #tpu.memory_space<vmem>>, %arg4: memref<1x16xf32, #tpu.memory_space<vmem>>, %arg5: memref<16x4xf32, #tpu.memory_space<vmem>>, %arg6: memref<3x4xf32, #tpu.memory_space<vmem>>, %arg7: memref<1x4xf32, #tpu.memory_space<vmem>>, %arg8: memref<8x4xf32, #tpu.memory_space<vmem>>) attributes {dimension_semantics = [#tpu.dimension_semantics<parallel>, #tpu.dimension_semantics<arbitrary>], iteration_bounds = array<i64: 1, 1>, scalar_prefetch = 0 : i64, scratch_operands = 0 : i64, tpu.core_type = #tpu.core_type<tc>, window_params = [{transform_indices = @transform_0, window_bounds = array<i64: 8, 3>}, {transform_indices = @transform_1, window_bounds = array<i64: 3, 16>}, {transform_indices = @transform_2, window_bounds = array<i64: 1, 16>}, {transform_indices = @transform_3, window_bounds = array<i64: 16, 4>}, {pipeline_mode = #tpu.pipeline_mode<synchronous>, transform_indices = @transform_4, window_bounds = array<i64: 3, 4>}, {pipeline_mode = #tpu.pipeline_mode<synchronous>, transform_indices = @transform_5, window_bounds = array<i64: 1, 4>}, {transform_indices = @transform_6, window_bounds = array<i64: 8, 4>}]} {
    %c0_i32 = arith.constant 0 : i32
    %0 = arith.cmpi eq, %arg1, %c0_i32 : i32
    %1 = arith.extui %0 : i1 to i32
    %c0_i32_0 = arith.constant 0 : i32
    %2 = arith.cmpi ne, %1, %c0_i32_0 : i32
    scf.if %2 {
      %c0_21 = arith.constant 0 : index
      %c0_22 = arith.constant 0 : index
      %35 = vector.load %arg2[%c0_21, %c0_22] : memref<8x3xf32, #tpu.memory_space<vmem>>, vector<8x3xf32>
      %c0_23 = arith.constant 0 : index
      %c0_24 = arith.constant 0 : index
      %36 = vector.load %arg6[%c0_23, %c0_24] : memref<3x4xf32, #tpu.memory_space<vmem>>, vector<3x4xf32>
      %cst_25 = arith.constant dense<0.000000e+00> : vector<8x4xf32>
      %37 = tpu.matmul %35, %36, %cst_25 {dimension_numbers = #tpu.dot_dimension_numbers<[1], [0], [0], [1], [0, 0, 1, 1], [], []>} : vector<8x3xf32>, vector<3x4xf32>, vector<8x4xf32> -> vector<8x4xf32>
      %c0_26 = arith.constant 0 : index
      %c0_27 = arith.constant 0 : index
      %38 = vector.load %arg7[%c0_26, %c0_27] : memref<1x4xf32, #tpu.memory_space<vmem>>, vector<1x4xf32>
      %39 = vector.broadcast %38 : vector<1x4xf32> to vector<8x4xf32>
      %40 = arith.addf %37, %39 : vector<8x4xf32>
      %c0_28 = arith.constant 0 : index
      %c0_29 = arith.constant 0 : index
      %41 = vector.load %arg8[%c0_28, %c0_29] : memref<8x4xf32, #tpu.memory_space<vmem>>, vector<8x4xf32>
      tpu.vector_store %arg8[%c0_28, %c0_29], %40 {strides = array<i32>} : memref<8x4xf32, #tpu.memory_space<vmem>>, vector<8x4xf32>,
    } else {
    }
    %c0 = arith.constant 0 : index
    %c0_1 = arith.constant 0 : index
    %3 = vector.load %arg2[%c0, %c0_1] : memref<8x3xf32, #tpu.memory_space<vmem>>, vector<8x3xf32>
    %4 = arith.mulf %3, %3 : vector<8x3xf32>
    %cst = arith.constant dense<0.000000e+00> : vector<8xf32>
    %5 = vector.multi_reduction <add>, %4, %cst [1] : vector<8x3xf32> to vector<8xf32>
    %6 = vector.shape_cast %5 : vector<8xf32> to vector<8x1xf32>
    %c0_2 = arith.constant 0 : index
    %c0_3 = arith.constant 0 : index
    %7 = vector.load %arg3[%c0_2, %c0_3] : memref<3x16xf32, #tpu.memory_space<vmem>>, vector<3x16xf32>
    %cst_4 = arith.constant dense<0.000000e+00> : vector<8x16xf32>
    %8 = tpu.matmul %3, %7, %cst_4 {dimension_numbers = #tpu.dot_dimension_numbers<[1], [0], [0], [1], [0, 0, 1, 1], [], []>} : vector<8x3xf32>, vector<3x16xf32>, vector<8x16xf32> -> vector<8x16xf32>
    %c0_5 = arith.constant 0 : index
    %c0_6 = arith.constant 0 : index
    %9 = vector.load %arg4[%c0_5, %c0_6] : memref<1x16xf32, #tpu.memory_space<vmem>>, vector<1x16xf32>
    %10 = vector.broadcast %6 : vector<8x1xf32> to vector<8x16xf32>
    %11 = vector.broadcast %9 : vector<1x16xf32> to vector<8x16xf32>
    %12 = arith.addf %10, %11 : vector<8x16xf32>
    %cst_7 = arith.constant 2.000000e+00 : f32
    %13 = vector.broadcast %cst_7 : f32 to vector<8x16xf32>
    %14 = arith.mulf %13, %8 : vector<8x16xf32>
    %15 = arith.subf %12, %14 : vector<8x16xf32>
    %cst_8 = arith.constant 0.000000e+00 : f32
    %16 = vector.broadcast %cst_8 : f32 to vector<8x16xf32>
    %17 = arith.maximumf %15, %16 : vector<8x16xf32>
    %cst_9 = arith.constant 0.000000e+00 : f32
    %18 = vector.broadcast %cst_9 : f32 to vector<8x16xf32>
    %19 = arith.cmpf ogt, %17, %18 : vector<8x16xf32>
    %cst_10 = arith.constant 1.000000e+00 : f32
    %20 = vector.broadcast %cst_10 : f32 to vector<8x16xf32>
    %21 = arith.select %19, %17, %20 : vector<8x16xi1>, vector<8x16xf32>
    %cst_11 = arith.constant 0.000000e+00 : f32
    %22 = vector.broadcast %cst_11 : f32 to vector<8x16xf32>
    %23 = arith.cmpf ogt, %17, %22 : vector<8x16xf32>
    %cst_12 = arith.constant 5.000000e-01 : f32
    %24 = vector.broadcast %cst_12 : f32 to vector<8x16xf32>
    %25 = arith.mulf %24, %17 : vector<8x16xf32>
    %26 = math.log %21 : vector<8x16xf32>
    %27 = arith.mulf %25, %26 : vector<8x16xf32>
    %cst_13 = arith.constant 0.000000e+00 : f32
    %28 = vector.broadcast %cst_13 : f32 to vector<8x16xf32>
    %29 = arith.select %23, %27, %28 : vector<8x16xi1>, vector<8x16xf32>
    %c0_14 = arith.constant 0 : index
    %c0_15 = arith.constant 0 : index
    %30 = vector.load %arg8[%c0_14, %c0_15] : memref<8x4xf32, #tpu.memory_space<vmem>>, vector<8x4xf32>
    %c0_16 = arith.constant 0 : index
    %c0_17 = arith.constant 0 : index
    %31 = vector.load %arg5[%c0_16, %c0_17] : memref<16x4xf32, #tpu.memory_space<vmem>>, vector<16x4xf32>
    %cst_18 = arith.constant dense<0.000000e+00> : vector<8x4xf32>
    %32 = tpu.matmul %29, %31, %cst_18 {dimension_numbers = #tpu.dot_dimension_numbers<[1], [0], [0], [1], [0, 0, 1, 1], [], []>} : vector<8x16xf32>, vector<16x4xf32>, vector<8x4xf32> -> vector<8x4xf32>
    %33 = arith.addf %30, %32 : vector<8x4xf32>
    %c0_19 = arith.constant 0 : index
    %c0_20 = arith.constant 0 : index
    %34 = vector.load %arg8[%c0_19, %c0_20] : memref<8x4xf32, #tpu.memory_space<vmem>>, vector<8x4xf32>
    tpu.vector_store %arg8[%c0_19, %c0_20], %33 {strides = array<i32>} : memref<8x4xf32, #tpu.memory_space<vmem>>, vector<8x4xf32>,
    return
  }
  func.func @transform_0(%arg0: i32, %arg1: i32) -> (i32, i32) {
    %c0_i32 = arith.constant 0 : i32
    %c0_i32_0 = arith.constant 0 : i32
    return %arg0, %c0_i32 : i32, i32
  }
  func.func @transform_1(%arg0: i32, %arg1: i32) -> (i32, i32) {
    %c0_i32 = arith.constant 0 : i32
    %c0_i32_0 = arith.constant 0 : i32
    return %c0_i32, %arg1 : i32, i32
  }
  func.func @transform_2(%arg0: i32, %arg1: i32) -> (i32, i32) {
    %c0_i32 = arith.constant 0 : i32
    %c0_i32_0 = arith.constant 0 : i32
    return %c0_i32, %arg1 : i32, i32
  }
  func.func @transform_3(%arg0: i32, %arg1: i32) -> (i32, i32) {
    %c0_i32 = arith.constant 0 : i32
    %c0_i32_0 = arith.constant 0 : i32
    return %arg1, %c0_i32 : i32, i32
  }
  func.func @transform_4(%arg0: i32, %arg1: i32) -> (i32, i32) {
    %c0_i32 = arith.constant 0 : i32
    %c0_i32_0 = arith.constant 0 : i32
    %c0_i32_1 = arith.constant 0 : i32
    return %c0_i32, %c0_i32_0 : i32, i32
  }
  func.func @transform_5(%arg0: i32, %arg1: i32) -> (i32, i32) {
    %c0_i32 = arith.constant 0 : i32
    %c0_i32_0 = arith.constant 0 : i32
    %c0_i32_1 = arith.constant 0 : i32
    return %c0_i32, %c0_i32_0 : i32, i32
  }
  func.func @transform_6(%arg0: i32, %arg1: i32) -> (i32, i32) {
    %c0_i32 = arith.constant 0 : i32
    %c0_i32_0 = arith.constant 0 : i32
    return %arg0, %c0_i32 : i32, i32
  }
}

</mosaic_0001>

<bundles_post_ra>
// kernel: tpu_custom_call.1
= control target key start
LH: loop header
LB: loop body
LE: loop exit
PB: predicated region body
PF: predicated region fallthrough
CT: control target
= control target key end

     0   :  { %vm40_vm0 = vcmask 1042432   ;;  %vm36_vm1 = vcmask 23552   ;;  %v341_v0 = vmov 0.0   ;;  %vm342_vm2 = vmmov 0   ;;  %s417_s1 = inlined_call_operand.vmem [shape: f32[3,16], index: 1, kind: input, shape index: {}]   ;;  %s418_s0 = inlined_call_operand.vmem [shape: f32[8,3], index: 0, kind: input, shape index: {}]   ;;  %s419_s4 = inlined_call_operand.vmem [shape: f32[3,4], index: 4, kind: input, shape index: {}]   ;;  %s420_s3 = inlined_call_operand.vmem [shape: f32[16,4], index: 3, kind: input, shape index: {}]   ;;  %s421_s2 = inlined_call_operand.vmem [shape: f32[1,16], index: 2, kind: input, shape index: {}]   ;;  %s422_s5 = inlined_call_operand.vmem [shape: f32[1,4], index: 5, kind: input, shape index: {}]   ;;  %s423_s6 = inlined_call_operand.vmem [shape: f32[8,4], index: 6, kind: output, shape index: {}]  }
   0x1   :  { %321 = vmatprep.subr.mxu1 %v341_v0  ;;  %v122_v1 = vld [vmem:[%s417_s1] sm:$0x7]  ;;  %323 = vmatprep.mubr.msk.f32.mxu1 %vm342_vm2, %v341_v0  ;;  %v220_v7 = vld [vmem:[%s420_s3 + $0x8] sm:$0xff]  ;;  %v343_v9 = vmov 0.0|0.0   ;;  %vm221_vm4 = vcmask 130048   ;;  %vm114_vm5 = vcmask 31744  }
   0x2   :  { %v116_v2 = vld [vmem:[%s418_s0] sm:$0xff]  ;;  %322 = vmatpush3.msk.msra.mxu1 %vm40_vm0, %v122_v1  ;;  %316 = vmatprep.subr.mxu0 %v341_v0 }
   0x3   :  { %v117_v3 = vmul.f32 %v116_v2, %v116_v2  ;;  %324 = vmatmul.mubr.msk.f32.vlgmr.msra.gmra.mrb[0].mxu1 %vm36_vm1, %v116_v2  ;;  %318 = vmatprep.mubr.msk.f32.mxu0 %vm342_vm2, %v341_v0  ;;  %v28_v5 = vld [vmem:[%s419_s4] sm:$0x7] }
   0x4   :  { %v219_v6 = vld [vmem:[%s420_s3] sm:$0xff]  ;;  %317 = vmatpush3.msk.msra.mxu0 %vm40_vm0, %v28_v5 }
   0x5   :  { %v119_v4 = vsel %vm36_vm1, %v117_v3, 0.0  ;;  %v334_v8 = vpack.c.bf16 %v220_v7, %v219_v6  ;;  %319 = vmatmul.mubr.msk.f32.vlgmr.msra.gmra.mrb[0].mxu0 %vm36_vm1, %v116_v2  ;;  %333 = vmatprep.subr.bf16.mxu0 %v343_v9  ;;  %v307_v11 = vld [vmem:[%s421_s2] ss:$0 sm:$0xff] }
   0x6   :  { %120 = vadd.xlane.f32.xlu0 %v119_v4  ;;  %330 = vmatprep.mubr.msk.f32.mxu0 %vm342_vm2, %v341_v0  ;;  %v302_v24 = vld [vmem:[%s422_s5] ss:$0 sm:$0xff] }
   0x7   :  { %335 = vmatpush3.bf16.msra.mxu0 %v334_v8 }
  0x93   :  { %v121_v10 = vpop.xlane.xlu0 %120 }
  0x94   :  { %v207_v12 = vadd.f32 %v307_v11, %v121_v10 }
  0xd6   :  { %v196_v13 = vpop.f32.mrb[0].mxu1 }
  0xd7   :  { %v208_v14 = vmul.f32 2.0, %v196_v13  ;;  %v325_v15 = vpop.f32.mrb[1].mxu1 }
  0xd8   :  { %v110_v25 = vpop.f32.mrb[0].mxu0 }
  0xd9   :  { %v209_v16 = vsub.f32 %v207_v12, %v208_v14  ;;  %v111_v26 = vadd.f32 %v302_v24, %v110_v25  ;;  %v320_v27 = vpop.f32.mrb[1].mxu0 }
  0xdb   :  { %v210_v17 = vmax.f32 %v209_v16, 0.0  ;;  %115 = vst.msk [vmem:[%s423_s6] sm:$0xff] %vm114_vm5, %v111_v26 }
  0xdd   :  { %vm211_vm3 = vcmp.gt.f32.partialorder %v210_v17, 0.0  ;;  %v213_v20 = vmul.f32 0.5, %v210_v17 }
  0xde   :  { %v212_v18 = vsel %vm211_vm3, %v210_v17, 1.0 }
  0xdf   :  { %339 = vlog2.f32 %v212_v18 }
  0xe2   :  { %v218_v28 = vld [vmem:[%s423_s6] sm:$0xff] }
  0xe9   :  { %v340_v19 = vpop.eup %339 }
  0xea   :  { %v215_v21 = vmul.f32 0.6931472, %v340_v19 }
  0xec   :  { %v216_v22 = vmul.f32 %v215_v21, %v213_v20 }
  0xee   :  { %v217_v23 = vsel %vm211_vm3, %v216_v22, 0.0 }
  0xef   :  { %331 = vmatmul.mubr.msk.f32.vlgmr.msra.gmra.mrb[2].mxu0 %vm221_vm4, %v217_v23 }
 0x1c2   :  { %v291_v29 = vpop.f32.mrb[2].mxu0 }
 0x1c3   :  { %v295_v30 = vadd.f32 %v291_v29, %v218_v28  ;;  %v332_v31 = vpop.f32.mrb[3].mxu0 }
 0x1c5   :  { %297 = vst.msk [vmem:[%s423_s6] sm:$0xff] %vm114_vm5, %v295_v30 }

</bundles_post_ra>
